<compile_context>
chip_gen: v5e
topology: v5e:2x2
jax: 0.10.0
libtpu: 0.0.40
codegen_flags: <defaults>
</compile_context>

<pallas_src>
import math
import functools

import jax
import jax.numpy as jnp
from jax.experimental import pallas as pl
from jax.experimental.pallas import tpu as pltpu


def _round_up(a, b):
    return ((a + b - 1) // b) * b


def _plan_levels(h, num_levels):
    """Static per-level pooling params + per-output-row valid source row ranges."""
    plans = []
    for i in range(num_levels):
        level = 2 ** i
        k = int(math.ceil(1.0 * h / level))
        p = int((k * level - h + 1) / 2)
        out_h = (h + 2 * p - k) // k + 1          # floor-mode pooling output size
        windows = tuple((max(0, j * k - p), min(h, (j + 1) * k - p))
                        for j in range(out_h))
        plans.append(dict(level=level, k=k, p=p, out_h=out_h, windows=windows))
    return plans


def _tpp_fused_kernel(x_ref, o_ref, *, w, plans, nested, pool_type):
    """Compute every pyramid level from one resident lane-dense (T, h*w) tile.

    x_ref : (T, h*w) VMEM block (row r of the image occupies lanes [r*w,(r+1)*w)).
    o_ref : (T, sum_i out_h_i*w) VMEM block (levels concatenated along lanes).
    """
    is_max = (pool_type == 'max_pool')

    def combine(a, b):
        if is_max:
            return jnp.maximum(a, b)
        # avg: accumulate the window sum in f32 (bf16/f16-safe).
        return a.astype(jnp.float32) + b.astype(jnp.float32)

    def reduce_rows(lo, hi):
        """Reduce image rows [lo, hi) of the flattened block -> (T, w)."""
        n = hi - lo
        if n <= 0:
            # Window entirely in padding (cannot happen when pad <= k/2).
            t = x_ref.shape[0]
            if is_max:
                fill = (-jnp.inf if jnp.issubdtype(x_ref.dtype, jnp.floating)
                        else jnp.iinfo(x_ref.dtype).min)
                return jnp.full((t, w), fill, dtype=x_ref.dtype)
            return jnp.zeros((t, w), jnp.float32)
        s = x_ref[:, lo * w:hi * w]               # contiguous lane slice load
        leftovers = []
        while n > 1:                              # log-depth halving fold (lane-wide VPU ops)
            if n % 2:
                leftovers.append(s[:, (n - 1) * w:])
                s = s[:, :(n - 1) * w]
                n -= 1
            half = n // 2
            s = combine(s[:, :half * w], s[:, half * w:])
            n = half
        for piece in leftovers:
            s = combine(s, piece)
        return s

    num_levels = len(plans)
    level_rows = [None] * num_levels
    order = range(num_levels - 1, -1, -1) if nested else range(num_levels)
    for i in order:
        plan = plans[i]
        if nested and i < num_levels - 1:
            # Coarser window = pairwise combine of the finer level's raw sums/maxes.
            finer = level_rows[i + 1]
            rows = [combine(finer[2 * j], finer[2 * j + 1])
                    for j in range(plan['out_h'])]
        else:
            rows = [reduce_rows(lo, hi) for (lo, hi) in plan['windows']]
        level_rows[i] = rows

    # Scale (avg: count_include_pad divisor = full kernel size k) and store each
    # pooled row to its static lane slice of the flattened output block.
    pos = 0
    for i in range(num_levels):
        inv = 1.0 / float(plans[i]['k'])
        for row in level_rows[i]:
            out_row = row if is_max else row.astype(jnp.float32) * inv
            o_ref[:, pos:pos + w] = out_row.astype(o_ref.dtype)
            pos += w


def _vmem_capacity_bytes():
    try:
        return int(pltpu.get_tpu_info().vmem_capacity_bytes)
    except Exception:
        pass
    try:
        kind = jax.devices()[0].device_kind.lower()
        if ('v2' in kind) or ('v3' in kind):
            return 16 * 1024 * 1024
        if ('v4' in kind) or ('v5' in kind) or ('v6' in kind):
            return 128 * 1024 * 1024
    except Exception:
        pass
    return 64 * 1024 * 1024                       # conservative (v7x physical VMEM)


def _choose_tile(bc, per_row_bytes, budget_bytes, max_tile_bc=None):
    """Pick (tile, grid) for the bs*c axis.

    Tries the largest 8-aligned exact divisor of bc within the VMEM budget;
    otherwise falls back to an 8-aligned tile with a cdiv grid (ragged tail
    block, masked by Pallas).  Caps the tile so the grid has >=2 steps when bc
    is big enough (megacore sharding on v7x).
    """
    t = max(1, int(budget_bytes // max(1, per_row_bytes)))
    t = min(t, bc)
    if max_tile_bc is not None:
        t = max(1, min(t, int(max_tile_bc)))
    if bc >= 16:
        t = min(t, max(8, -(-bc // 2)))           # at least 2 grid steps, tiles stay >=8 rows
    if t >= bc:
        return bc, 1                              # single block (block dim == full dim)
    best = None
    for cand in range(t, 0, -1):                  # exact divisor, 8-row aligned
        if bc % cand == 0 and (cand % 8 == 0 or cand == bc):
            best = cand
            break
    if best is not None and best * 4 >= t:        # divisor did not degrade badly
        return best, bc // best
    t8 = max(8, (t // 8) * 8)                     # ragged: 8-aligned tile, cdiv grid
    return t8, -(-bc // t8)


def tpp_layer(x, num_levels, pool_type='max_pool', max_tile_bc=None):
    """TPPLayer forward.  x: (bs, c, h, w) -> (bs, sum_i c*out_h_i*w)."""
    bs, c, h, w = x.shape
    bc = bs * c
    hw = h * w
    x2 = x.reshape(bc, hw)                        # zero-copy lane-dense view of NCHW

    plans = _plan_levels(h, num_levels)
    out_hs = [p['out_h'] for p in plans]
    seg_lens = [oh * w for oh in out_hs]
    total_out = sum(seg_lens)

    # Pyramid (nested) reuse whenever windows nest exactly (max and avg).
    nested = (num_levels >= 2
              and h % (2 ** (num_levels - 1)) == 0
              and all(p['p'] == 0 for p in plans))

    vmem_cap = _vmem_capacity_bytes()
    vmem_limit = int(vmem_cap * 3 // 4)           # ~48 MiB v7x, ~96 MiB v5e/v6e
    itemsize = jnp.dtype(x.dtype).itemsize
    per_row = (2 * (_round_up(hw, 128) + _round_up(total_out, 128)) * itemsize  # dbl-buffered I/O
               + _round_up(hw, 128) * 4)                                        # f32 fold scratch
    tile, grid_n = _choose_tile(bc, per_row, budget_bytes=vmem_limit * 3 // 4,
                                max_tile_bc=max_tile_bc)

    kernel = functools.partial(_tpp_fused_kernel, w=w, plans=plans, nested=nested,
                               pool_type=pool_type)

    # Deeper input pipelining only pays off for small blocks and several steps.
    deep = (tile * hw * itemsize < 256 * 1024) and grid_n >= 3

    def build(deep_pipeline):
        if deep_pipeline:
            in_spec = pl.BlockSpec((tile, hw), lambda b: (b, 0),
                                   pipeline_mode=pl.Buffered(3))
        else:
            in_spec = pl.BlockSpec((tile, hw), lambda b: (b, 0))
        return pl.pallas_call(
            kernel,
            out_shape=jax.ShapeDtypeStruct((bc, total_out), x.dtype),
            grid=(grid_n,),
            in_specs=[in_spec],
            out_specs=pl.BlockSpec((tile, total_out), lambda b: (b, 0)),
            compiler_params=pltpu.CompilerParams(
                dimension_semantics=("parallel",),
                vmem_limit_bytes=vmem_limit),
        )(x2)

    if deep:
        try:
            out = build(True)
        except Exception:                         # Buffered hint unavailable -> default pipelining
            out = build(False)
    else:
        out = build(False)

    # Small output-side glue (tiny arrays): per level, matches torch's
    # (bs, c, out_h, w).view(bs, -1) followed by feature concatenation.
    out3 = out.reshape(bs, c, total_out)
    pieces = []
    off = 0
    for seg in seg_lens:
        pieces.append(out3[:, :, off:off + seg].reshape(bs, c * seg))
        off += seg
    return pieces[0] if len(pieces) == 1 else jnp.concatenate(pieces, axis=1)


def tpp_layer_ref(x, num_levels, pool_type='max_pool'):
    """Pure-JAX reference mirroring F.max_pool2d/avg_pool2d semantics."""
    bs, c, h, w = x.shape
    pad_value = -jnp.inf if pool_type == 'max_pool' else 0.0
    pieces = []
    for i in range(num_levels):
        level = 2 ** i
        k = int(math.ceil(1.0 * h / level))
        p = int((k * level - h + 1) / 2)
        out_h = (h + 2 * p - k) // k + 1
        total = out_h * k
        back = max(0, total - p - h)
        xp = jnp.pad(x, ((0, 0), (0, 0), (p, back), (0, 0)),
                     constant_values=pad_value)[:, :, :total, :]
        xr = xp.reshape(bs, c, out_h, k, w)
        if pool_type == 'max_pool':
            t = jnp.max(xr, axis=3)
        else:
            t = (jnp.sum(xr.astype(jnp.float32), axis=3) / k).astype(x.dtype)
        pieces.append(t.reshape(bs, -1))
    return jnp.concatenate(pieces, axis=1)


if __name__ == "__main__":
    key = jax.random.PRNGKey(0)

    # (NCHW shape, num_levels, max_tile_bc override, dtype)
    configs = [
        ((2, 4, 16, 16), 3, None, jnp.float32),   # nested (power-of-2 h), single-tile grid
        ((4, 16, 16, 16), 3, 16, jnp.float32),    # bc=64 -> 4 parallel grid steps (+deep pipeline)
        ((2, 4, 10, 16), 3, None, jnp.float32),   # h=10: padded, uneven windows
        ((3, 7, 10, 16), 3, None, jnp.float32),   # bc=21: ragged cdiv grid (masked tail block)
        ((2, 4, 16, 16), 3, None, jnp.bfloat16),  # bf16: f32 accumulation for avg pooling
    ]

    for cfg_idx, (shape, num_levels, mtile, dt) in enumerate(configs):
        key, sub = jax.random.split(key)
        x = jax.random.normal(sub, shape, dtype=jnp.float32).astype(dt)
        for pool_type in ('max_pool', 'avg_pool'):
            out = jax.block_until_ready(
                tpp_layer(x, num_levels, pool_type, max_tile_bc=mtile))
            ref = tpp_layer_ref(x, num_levels, pool_type)
            assert out.shape == ref.shape, (cfg_idx, pool_type, out.shape, ref.shape)
            if dt == jnp.bfloat16:
                ok = jnp.allclose(out.astype(jnp.float32), ref.astype(jnp.float32),
                                  atol=2e-2, rtol=2e-2)
            else:
                ok = jnp.allclose(out, ref, atol=1e-5, rtol=1e-5)
            assert ok, f"mismatch vs reference: cfg={cfg_idx} pool={pool_type}"

    # Canonical shape check: (2, 4, 16, 16), 3 levels -> (2, 4*(1+2+4)*16)
    x0 = jax.random.normal(jax.random.PRNGKey(0), (2, 4, 16, 16), dtype=jnp.float32)
    out0 = jax.block_until_ready(tpp_layer(x0, 3, 'max_pool'))
    assert out0.shape == (2, 4 * (1 + 2 + 4) * 16), out0.shape

    print("KERNEL_OK")
</pallas_src>

<mosaic_0001>
module attributes {stable_mosaic.version = 11 : i64} {
  func.func @_tpp_fused_kernel(%arg0: i32, %arg1: memref<8x256xf32, #tpu.memory_space<vmem>>, %arg2: memref<8x112xf32, #tpu.memory_space<vmem>>) attributes {dimension_semantics = [#tpu.dimension_semantics<parallel>], iteration_bounds = array<i64: 1>, scalar_prefetch = 0 : i64, scratch_operands = 0 : i64, tpu.core_type = #tpu.core_type<tc>, window_params = [{transform_indices = @transform_0, window_bounds = array<i64: 8, 256>}, {transform_indices = @transform_1, window_bounds = array<i64: 8, 112>}]} {
    %c0 = arith.constant 0 : index
    %c0_0 = arith.constant 0 : index
    %0 = vector.load %arg1[%c0, %c0_0] : memref<8x256xf32, #tpu.memory_space<vmem>>, vector<8x64xf32>
    %1 = vector.extract_strided_slice %0 {offsets = [0, 0], sizes = [8, 32], strides = [1, 1]} : vector<8x64xf32> to vector<8x32xf32>
    %2 = vector.extract_strided_slice %0 {offsets = [0, 32], sizes = [8, 32], strides = [1, 1]} : vector<8x64xf32> to vector<8x32xf32>
    %3 = arith.maximumf %1, %2 : vector<8x32xf32>
    %4 = vector.extract_strided_slice %3 {offsets = [0, 0], sizes = [8, 16], strides = [1, 1]} : vector<8x32xf32> to vector<8x16xf32>
    %5 = vector.extract_strided_slice %3 {offsets = [0, 16], sizes = [8, 16], strides = [1, 1]} : vector<8x32xf32> to vector<8x16xf32>
    %6 = arith.maximumf %4, %5 : vector<8x16xf32>
    %c0_1 = arith.constant 0 : index
    %c64 = arith.constant 64 : index
    %7 = vector.load %arg1[%c0_1, %c64] : memref<8x256xf32, #tpu.memory_space<vmem>>, vector<8x64xf32>
    %8 = vector.extract_strided_slice %7 {offsets = [0, 0], sizes = [8, 32], strides = [1, 1]} : vector<8x64xf32> to vector<8x32xf32>
    %9 = vector.extract_strided_slice %7 {offsets = [0, 32], sizes = [8, 32], strides = [1, 1]} : vector<8x64xf32> to vector<8x32xf32>
    %10 = arith.maximumf %8, %9 : vector<8x32xf32>
    %11 = vector.extract_strided_slice %10 {offsets = [0, 0], sizes = [8, 16], strides = [1, 1]} : vector<8x32xf32> to vector<8x16xf32>
    %12 = vector.extract_strided_slice %10 {offsets = [0, 16], sizes = [8, 16], strides = [1, 1]} : vector<8x32xf32> to vector<8x16xf32>
    %13 = arith.maximumf %11, %12 : vector<8x16xf32>
    %c0_2 = arith.constant 0 : index
    %c128 = arith.constant 128 : index
    %14 = vector.load %arg1[%c0_2, %c128] : memref<8x256xf32, #tpu.memory_space<vmem>>, vector<8x64xf32>
    %15 = vector.extract_strided_slice %14 {offsets = [0, 0], sizes = [8, 32], strides = [1, 1]} : vector<8x64xf32> to vector<8x32xf32>
    %16 = vector.extract_strided_slice %14 {offsets = [0, 32], sizes = [8, 32], strides = [1, 1]} : vector<8x64xf32> to vector<8x32xf32>
    %17 = arith.maximumf %15, %16 : vector<8x32xf32>
    %18 = vector.extract_strided_slice %17 {offsets = [0, 0], sizes = [8, 16], strides = [1, 1]} : vector<8x32xf32> to vector<8x16xf32>
    %19 = vector.extract_strided_slice %17 {offsets = [0, 16], sizes = [8, 16], strides = [1, 1]} : vector<8x32xf32> to vector<8x16xf32>
    %20 = arith.maximumf %18, %19 : vector<8x16xf32>
    %c0_3 = arith.constant 0 : index
    %c192 = arith.constant 192 : index
    %21 = vector.load %arg1[%c0_3, %c192] : memref<8x256xf32, #tpu.memory_space<vmem>>, vector<8x64xf32>
    %22 = vector.extract_strided_slice %21 {offsets = [0, 0], sizes = [8, 32], strides = [1, 1]} : vector<8x64xf32> to vector<8x32xf32>
    %23 = vector.extract_strided_slice %21 {offsets = [0, 32], sizes = [8, 32], strides = [1, 1]} : vector<8x64xf32> to vector<8x32xf32>
    %24 = arith.maximumf %22, %23 : vector<8x32xf32>
    %25 = vector.extract_strided_slice %24 {offsets = [0, 0], sizes = [8, 16], strides = [1, 1]} : vector<8x32xf32> to vector<8x16xf32>
    %26 = vector.extract_strided_slice %24 {offsets = [0, 16], sizes = [8, 16], strides = [1, 1]} : vector<8x32xf32> to vector<8x16xf32>
    %27 = arith.maximumf %25, %26 : vector<8x16xf32>
    %28 = arith.maximumf %6, %13 : vector<8x16xf32>
    %29 = arith.maximumf %20, %27 : vector<8x16xf32>
    %30 = arith.maximumf %28, %29 : vector<8x16xf32>
    %c0_4 = arith.constant 0 : index
    %c0_5 = arith.constant 0 : index
    %31 = vector.load %arg2[%c0_4, %c0_5] : memref<8x112xf32, #tpu.memory_space<vmem>>, vector<8x16xf32>
    tpu.vector_store %arg2[%c0_4, %c0_5], %30 {strides = array<i32>} : memref<8x112xf32, #tpu.memory_space<vmem>>, vector<8x16xf32>,
    %c0_6 = arith.constant 0 : index
    %c16 = arith.constant 16 : index
    %32 = vector.load %arg2[%c0_6, %c16] : memref<8x112xf32, #tpu.memory_space<vmem>>, vector<8x16xf32>
    tpu.vector_store %arg2[%c0_6, %c16], %28 {strides = array<i32>} : memref<8x112xf32, #tpu.memory_space<vmem>>, vector<8x16xf32>,
    %c0_7 = arith.constant 0 : index
    %c32 = arith.constant 32 : index
    %33 = vector.load %arg2[%c0_7, %c32] : memref<8x112xf32, #tpu.memory_space<vmem>>, vector<8x16xf32>
    tpu.vector_store %arg2[%c0_7, %c32], %29 {strides = array<i32>} : memref<8x112xf32, #tpu.memory_space<vmem>>, vector<8x16xf32>,
    %c0_8 = arith.constant 0 : index
    %c48 = arith.constant 48 : index
    %34 = vector.load %arg2[%c0_8, %c48] : memref<8x112xf32, #tpu.memory_space<vmem>>, vector<8x16xf32>
    tpu.vector_store %arg2[%c0_8, %c48], %6 {strides = array<i32>} : memref<8x112xf32, #tpu.memory_space<vmem>>, vector<8x16xf32>,
    %c0_9 = arith.constant 0 : index
    %c64_10 = arith.constant 64 : index
    %35 = vector.load %arg2[%c0_9, %c64_10] : memref<8x112xf32, #tpu.memory_space<vmem>>, vector<8x16xf32>
    tpu.vector_store %arg2[%c0_9, %c64_10], %13 {strides = array<i32>} : memref<8x112xf32, #tpu.memory_space<vmem>>, vector<8x16xf32>,
    %c0_11 = arith.constant 0 : index
    %c80 = arith.constant 80 : index
    %36 = vector.load %arg2[%c0_11, %c80] : memref<8x112xf32, #tpu.memory_space<vmem>>, vector<8x16xf32>
    tpu.vector_store %arg2[%c0_11, %c80], %20 {strides = array<i32>} : memref<8x112xf32, #tpu.memory_space<vmem>>, vector<8x16xf32>,
    %c0_12 = arith.constant 0 : index
    %c96 = arith.constant 96 : index
    %37 = vector.load %arg2[%c0_12, %c96] : memref<8x112xf32, #tpu.memory_space<vmem>>, vector<8x16xf32>
    tpu.vector_store %arg2[%c0_12, %c96], %27 {strides = array<i32>} : memref<8x112xf32, #tpu.memory_space<vmem>>, vector<8x16xf32>,
    return
  }
  func.func @transform_0(%arg0: i32) -> (i32, i32) {
    %c0_i32 = arith.constant 0 : i32
    %c0_i32_0 = arith.constant 0 : i32
    return %arg0, %c0_i32 : i32, i32
  }
  func.func @transform_1(%arg0: i32) -> (i32, i32) {
    %c0_i32 = arith.constant 0 : i32
    %c0_i32_0 = arith.constant 0 : i32
    return %arg0, %c0_i32 : i32, i32
  }
}

</mosaic_0001>

<bundles_post_ra>
// kernel: tpu_custom_call.1
= control target key start
LH: loop header
LB: loop body
LE: loop exit
PB: predicated region body
PF: predicated region fallthrough
CT: control target
= control target key end

     0   :  { %6 = vsyncpa [#allocation3], 0  ;;  %s190_s0 = inlined_call_operand.hbm [shape: f32[8,256], index: 0, kind: input, shape index: {}]   ;;  %s191_s1 = inlined_call_operand.hbm [shape: f32[8,112], index: 1, kind: output, shape index: {}]  }
   0x1   :  { %7 = vsyncpa [#allocation4], 0  ;;  %s13_s8 = sshll.u32 %s190_s0, 4  ;;  %s165_s9 = smov [#allocation2]   ;;  %s14_s8 = int_to_ptr.hbm [resolvable:$true] %s13_s8 }
   0x2   :  { %s15_s10 = sshll.u32 %s165_s9, 4  ;;  %s16_s10 = int_to_ptr.vmem [resolvable:$true] %s15_s10 }
   0x3   :  { %18 = dma.hbm_to_vmem [thread:$0]  %s14_s8, 256, %s16_s10, [#allocation3]  }
   0x4   :  { %161 = dma.done.wait [#allocation3], 256  }
   0x5   :  { %162 = vsyncadd [#allocation3], 4294967040  ;;  %v23_v0 = vld [vmem:[#allocation2] sm:$0xff]  ;;  %s166_s11 = smov 96   ;;  %v34_v1 = vld [vmem:[#allocation2 + $0x8] sm:$0xff]  ;;  %s167_s12 = smov 112  }
   0x6   :  { %25 = vrot.lane.b32.xlu0 %v23_v0, %s166_s11  ;;  %s168_s0 = smov 64   ;;  %s169_s13 = smov 48   ;;  %vm56_vm0 = vcmask 130048   ;;  %vm62_vm1 = vcmask 261248   ;;  %vm68_vm2 = vcmask 392448   ;;  %vm73_vm3 = vcmask 523648  }
   0x7   :  { %s170_s14 = smov 16   ;;  %s171_s15 = smov 80   ;;  %vm75_vm4 = vcmask 654848   ;;  %vm80_vm5 = vcmask 786048   ;;  %vm85_vm6 = vcmask 917248  }
   0x8   :  { %s172_s16 = smov 32   ;;  %s173_s17 = smov [#allocation5]  }
   0x9   :  { %s92_s18 = sshll.u32 %s173_s17, 4  ;;  %s94_s21 = sshll.u32 %s191_s1, 4  ;;  %s93_s18 = int_to_ptr.vmem [resolvable:$true] %s92_s18  ;;  %s95_s21 = int_to_ptr.hbm [resolvable:$true] %s94_s21 }
   0xe   :  { %36 = vrot.lane.b32.xlu0 %v34_v1, %s166_s11 }
  0x78   :  { %v26_v2 = vpop.permute.xlu0 %25 }
  0x79   :  { %v28_v3 = vmax.f32 %v23_v0, %v26_v2 }
  0x7b   :  { %30 = vrot.lane.b32.xlu1 %v28_v3, %s167_s12 }
  0x80   :  { %v37_v4 = vpop.permute.xlu0 %36 }
  0x81   :  { %v39_v5 = vmax.f32 %v34_v1, %v37_v4 }
  0x83   :  { %41 = vrot.lane.b32.xlu1 %v39_v5, %s167_s12 }
  0xed   :  { %v31_v6 = vpop.permute.xlu1 %30 }
  0xee   :  { %v33_v7 = vmax.f32 %v28_v3, %v31_v6 }
  0xf0   :  { %46 = vrot.lane.b32.xlu2 %v33_v7, %s168_s0 }
  0xf5   :  { %v42_v8 = vpop.permute.xlu1 %41 }
  0xf6   :  { %v44_v9 = vmax.f32 %v39_v5, %v42_v8 }
  0xf8   :  { %51 = vrot.lane.b32.xlu2 %v44_v9, %s168_s0 }
 0x100   :  { %70 = vrot.lane.b32.xlu2 %v33_v7, %s169_s13 }
 0x14a   :  { %v47_v10 = vpop.permute.xlu2 %46 }
 0x14b   :  { %v49_v11 = vmax.f32 %v33_v7, %v47_v10 }
 0x14d   :  { %59 = vrot.lane.b32.xlu0 %v49_v11, %s170_s14 }
 0x152   :  { %v52_v12 = vpop.permute.xlu2 %51 }
 0x153   :  { %v54_v13 = vmax.f32 %v44_v9, %v52_v12 }
 0x155   :  { %v55_v14 = vmax.f32 %v49_v11, %v54_v13  ;;  %77 = vrot.lane.b32.xlu0 %v44_v9, %s171_s15  ;;  %65 = vrot.lane.b32.xlu1 %v54_v13, %s172_s16 }
 0x157   :  { %57 = vst.msk [vmem:[#allocation5] sm:$0xff] %vm56_vm0, %v55_v14 }
 0x15a   :  { %v71_v17 = vpop.permute.xlu2 %70 }
 0x15d   :  { %82 = vrot.lane.b32.xlu1 %v44_v9, %s172_s16 }
 0x1bf   :  { %v60_v15 = vpop.permute.xlu0 %59 }
 0x1c0   :  { %63 = vst.msk [vmem:[#allocation5] sm:$0xff] %vm62_vm1, %v60_v15 }
 0x1c7   :  { %v66_v16 = vpop.permute.xlu1 %65  ;;  %v78_v18 = vpop.permute.xlu0 %77 }
 0x1c8   :  { %69 = vst.msk [vmem:[#allocation5] sm:$0xff] %vm68_vm2, %v66_v16 }
 0x1c9   :  { %74 = vst.msk [vmem:[#allocation5] sm:$0xff] %vm73_vm3, %v71_v17 }
 0x1ca   :  { %76 = vst.msk [vmem:[#allocation5] sm:$0xff] %vm75_vm4, %v33_v7 }
 0x1cb   :  { %81 = vst.msk [vmem:[#allocation5] sm:$0xff] %vm80_vm5, %v78_v18 }
 0x1cf   :  { %v83_v19 = vpop.permute.xlu1 %82 }
 0x1d0   :  { %86 = vst.msk [vmem:[#allocation5] sm:$0xff] %vm85_vm6, %v83_v19 }
 0x1d1   :  { %97 = dma.vmem_to_hbm [thread:$0]  %s93_s18, 128, %s95_s21, [#allocation4]  }
 0x1d2   :  { %163 = dma.done.wait [#allocation4], 128  }
 0x1d3   :  { %164 = vsyncadd [#allocation4], 4294967168 }
 0x1d4   :  { %102 = vsyncpa [#allocation3], 1 }
 0x1d5   :  { %103 = vsyncpa [#allocation4], 1 }

</bundles_post_ra>
